<compile_context>
chip_gen: v5e
topology: v5e:2x2
jax: 0.10.0
libtpu: 0.0.40
codegen_flags: <defaults>
</compile_context>

<pallas_src>
import functools

import jax
import jax.numpy as jnp
import numpy as np
from jax.experimental import pallas as pl
from jax.experimental.pallas import tpu as pltpu


def _abs_pow(d, gamma):
    """d**gamma for d >= 0, specialized at trace time (avoids exp/log when possible)."""
    if gamma == 1.0:
        return d
    if gamma == 0.5:
        return jnp.sqrt(d)
    if gamma == 1.5:
        return d * jnp.sqrt(d)
    if gamma == 2.0:
        return d * d
    if gamma == 2.5:
        return d * d * jnp.sqrt(d)
    if gamma == 3.0:
        return d * d * d
    if float(gamma) == int(gamma) and 0 < int(gamma) <= 8:
        out = d
        for _ in range(int(gamma) - 1):
            out = out * d
        return out
    # General case: clamp the base so log(0) never yields -inf/NaN intermediates.
    return jnp.exp(gamma * jnp.log(jnp.maximum(d, 1e-30)))


def _nr_dice_ce_kernel(x_ref, lab_ref, out_ref, acc_ce, acc_num, acc_p2,
                       *, hw, gamma, masked):
    """One (image b, pixel-tile t) step.

    x_ref:   (1, C, TS, 128) logits block (f32 or bf16)
    lab_ref: (1, TS, 128) int32 labels block
    out_ref: (1, 3, 128) per-image lane partials [ce, |p-y|^g, p^2]
    acc_*:   (TS, 128) f32 VMEM vector accumulators (persist across t, reset at t==0)
    """
    t = pl.program_id(1)
    last = pl.num_programs(1) - 1

    @pl.when(t == 0)
    def _():
        acc_ce[...] = jnp.zeros_like(acc_ce)
        acc_num[...] = jnp.zeros_like(acc_num)
        acc_p2[...] = jnp.zeros_like(acc_p2)

    lab = lab_ref[0]                              # (TS, 128) int32
    c = x_ref.shape[1]
    ts, tl = lab.shape

    # Channel-slab access: upcast exactly once if the input is not f32.
    # TODO(synk): for very large num_class (>~32) switch these unrolled Python
    # loops to lax.fori_loop over channel chunks with es held in VMEM scratch.
    if x_ref.dtype != jnp.float32:
        xs = [x_ref[0, k].astype(jnp.float32) for k in range(c)]
        _x = lambda k: xs[k]
    else:
        _x = lambda k: x_ref[0, k]

    # pass 1: channel max (for stable softmax) and logit-at-label (for CE).
    m = _x(0)
    x_lab = jnp.where(lab == 0, m, 0.0)
    for k in range(1, c):
        xk = _x(k)
        m = jnp.maximum(m, xk)
        x_lab = x_lab + jnp.where(lab == k, xk, 0.0)

    # pass 2: exp, channel sum of exp, channel sum of exp^2.
    es = []
    se = None
    e2 = None
    for k in range(c):
        ek = jnp.exp(_x(k) - m)
        es.append(ek)
        se = ek if se is None else se + ek
        e2 = ek * ek if e2 is None else e2 + ek * ek

    ce_pix = (m - x_lab) + jnp.log(se)            # logsumexp - logit_at_label

    # pass 3: un-normalized noise-robust-dice numerator.
    #   |p_k - y_k|^g = inv^g * |e_k - y_k*se|^g   (inv = 1/se, factored out of loop)
    se_eps = se * 1e-4                            # clamp(one_hot)=1e-4 branch, scaled by se
    num_un = None
    for k in range(c):
        yk_se = jnp.where(lab == k, se, se_eps)   # y_k * se   (clamp(one_hot) in {1e-4, 1})
        dk = jnp.abs(es[k] - yk_se)
        term = _abs_pow(dk, gamma)
        num_un = term if num_un is None else num_un + term

    inv = pl.reciprocal(se, approx=True)
    inv = inv * (2.0 - se * inv)                  # one Newton step -> ~full f32 precision
    num_pix = num_un * _abs_pow(inv, gamma)       # sum_k |p_k - y_k|^gamma
    p2_pix = e2 * (inv * inv)                     # sum_k p_k^2

    def _accumulate(ce_v, num_v, p2_v):
        acc_ce[...] += ce_v
        acc_num[...] += num_v
        acc_p2[...] += p2_v

    if masked:
        # Only the last tile has padded / out-of-bounds pixels: keep the mask
        # math off the steady-state path, and use selects (not multiplies) so
        # garbage (possibly inf/NaN) in the OOB tail never reaches the acc.
        @pl.when(t != last)
        def _():
            _accumulate(ce_pix, num_pix, p2_pix)

        @pl.when(t == last)
        def _():
            base = t * (ts * tl)
            r = jax.lax.broadcasted_iota(jnp.int32, (ts, tl), 0)
            l = jax.lax.broadcasted_iota(jnp.int32, (ts, tl), 1)
            valid = (base + r * tl + l) < hw
            _accumulate(jnp.where(valid, ce_pix, 0.0),
                        jnp.where(valid, num_pix, 0.0),
                        jnp.where(valid, p2_pix, 0.0))
    else:
        _accumulate(ce_pix, num_pix, p2_pix)

    @pl.when(t == last)
    def _():
        out_ref[0, 0:1, :] = jnp.sum(acc_ce[...], axis=0, keepdims=True)
        out_ref[0, 1:2, :] = jnp.sum(acc_num[...], axis=0, keepdims=True)
        out_ref[0, 2:3, :] = jnp.sum(acc_p2[...], axis=0, keepdims=True)


def _tpu_vmem_capacity_bytes():
    try:
        return int(getattr(pltpu.get_tpu_info(), "vmem_capacity_bytes", 128 << 20))
    except Exception:
        return 128 << 20


def _pick_tiling(c, vmem_cap):
    """Per-generation tile rows + scoped-VMEM limit."""
    if vmem_cap >= (100 << 20):          # v5e / v6e: 128 MiB physical VMEM
        vmem_limit = 64 << 20
        target_block_bytes = 4 << 20     # ~4 MiB of f32 logits per grid step
    else:                                # v7x: 64 MiB physical VMEM per TensorCore
        vmem_limit = 42 << 20
        target_block_bytes = 3 << 19     # ~1.5 MiB logit block
    # Live-VMEM model per pixel-row of 128 lanes (f32 words):
    #   2*C input double-buffer + C upcast slabs + C exp slabs
    #   + ~12 temporaries + 3 accumulators + 2 label buffers
    bytes_per_row = (4 * c + 17) * 128 * 4
    rows_by_vmem = int(0.6 * vmem_limit) // bytes_per_row
    rows_by_block = target_block_bytes // (c * 128 * 4)
    tile_rows = max(8, min(rows_by_vmem, rows_by_block, 4096))
    tile_rows = (tile_rows // 8) * 8
    return tile_rows, vmem_limit


def nr_dice_ce_loss(pred_nchw, labels_nhw, *, num_class, alpha, beta, gamma,
                    tile_rows=None):
    """JAX/Pallas equivalent of NR_Dice_CELoss.forward. Returns dict of scalars."""
    n, c, h, w = pred_nchw.shape
    assert c == num_class
    hw = h * w
    p_total = n * hw

    rows = pl.cdiv(hw, 128)                       # pixel rows of 128 lanes
    hw128 = rows * 128

    vmem_cap = _tpu_vmem_capacity_bytes()
    auto_rows, vmem_limit = _pick_tiling(c, vmem_cap)
    if tile_rows is None:
        tile_rows = auto_rows
    else:
        tile_rows = max(8, (int(tile_rows) // 8) * 8)   # guard tile_rows < 8

    # NCHW -> (N, C, rows, 128): contiguous reshape (no HBM transpose).
    x = pred_nchw.reshape(n, c, hw)
    lab = labels_nhw.reshape(n, hw).astype(jnp.int32)
    if hw128 != hw:
        # TODO(synk): ragged H*W (not a multiple of 128) still needs a tiny
        # element-level pad (<128 px per plane) to make the lane reshape legal.
        x = jnp.pad(x, ((0, 0), (0, 0), (0, hw128 - hw)))
        lab = jnp.pad(lab, ((0, 0), (0, hw128 - hw)))
    x = x.reshape(n, c, rows, 128)
    lab = lab.reshape(n, rows, 128)

    if rows <= tile_rows:
        ts = rows                                 # single tile: block == full dim
        num_tiles = 1
    else:
        ts = tile_rows                            # (8,128)-aligned
        num_tiles = pl.cdiv(rows, ts)
    # Masking needed if the last tile holds padded elements or OOB rows.
    masked = (hw128 != hw) or (num_tiles * ts != rows)

    kernel = functools.partial(_nr_dice_ce_kernel, hw=hw, gamma=float(gamma),
                               masked=masked)

    grid_spec = pltpu.PrefetchScalarGridSpec(
        num_scalar_prefetch=0,
        grid=(n, num_tiles),
        in_specs=[
            pl.BlockSpec((1, c, ts, 128), lambda b, t: (b, 0, t, 0)),
            pl.BlockSpec((1, ts, 128), lambda b, t: (b, t, 0)),
        ],
        out_specs=pl.BlockSpec((1, 3, 128), lambda b, t: (b, 0, 0)),
        scratch_shapes=[pltpu.VMEM((ts, 128), jnp.float32)] * 3,
    )

    def _call(dim_sems):
        out = pl.pallas_call(
            kernel,
            out_shape=jax.ShapeDtypeStruct((n, 3, 128), jnp.float32),
            grid_spec=grid_spec,
            compiler_params=pltpu.CompilerParams(
                dimension_semantics=dim_sems,
                vmem_limit_bytes=vmem_limit,
            ),
        )(x, lab)
        return jax.block_until_ready(out)

    try:
        # v7x: shard the batch axis across the 2 TensorCores.
        # TODO(synk): for N==1 on v7x, split the pixel-tile axis across cores
        # instead (per-core partials summed in the wrapper).
        partials = _call((pltpu.CORE_PARALLEL, pltpu.ARBITRARY))
    except Exception:
        # Single-TC chips / runtimes that reject CORE_PARALLEL.
        partials = _call(("parallel", "arbitrary"))

    sums = jnp.sum(partials, axis=(0, 2))         # [ce_sum, num_sum, p2_sum]
    ce_loss = sums[0] / p_total                   # CrossEntropyLoss mean reduction
    # sum(clamp(one_hot)^2) is analytic: 1.0 on the label channel, 1e-4 elsewhere.
    y2_sum = float(p_total) * (1.0 + (num_class - 1) * 1e-8)
    nr_dice = sums[1] / (sums[2] + y2_sum + 1e-6)
    total = alpha * ce_loss + beta * nr_dice
    return {"ce": ce_loss, "NR_dice": nr_dice, "total": total}


def _reference(pred_nchw, labels_nhw, *, num_class, alpha, beta, gamma):
    """Pure-JAX reference mirroring the PyTorch module (for validation)."""
    x = pred_nchw.astype(jnp.float32)
    logp = jax.nn.log_softmax(x, axis=1)                                   # (N,C,H,W)
    oh = jax.nn.one_hot(labels_nhw, num_class, axis=1, dtype=jnp.float32)  # (N,C,H,W)
    ce = -jnp.mean(jnp.sum(logp * oh, axis=1))
    p = jax.nn.softmax(x, axis=1)
    y = jnp.clip(oh, 0.0001, 1.0)
    nr = jnp.sum(jnp.abs(p - y) ** gamma) / (jnp.sum(p ** 2) + jnp.sum(y ** 2) + 1e-6)
    return {"ce": ce, "NR_dice": nr, "total": alpha * ce + beta * nr}


if __name__ == "__main__":
    # deterministic "args" for the module (synthetic — no checkpoint load)
    NUM_CLASS = 4
    ALPHA = 0.5       # args.NR_Dice_CE_alpha
    BETA = 1.0        # args.NR_Dice_CE_beta
    GAMMA = 1.5       # args.NR_Dice_CE_gamma

    N, C, H, W = 2, NUM_CLASS, 16, 16
    key = jax.random.PRNGKey(0)
    k_pred, k_lab = jax.random.split(key)
    pred = jax.random.normal(k_pred, (N, C, H, W), dtype=jnp.float32)
    labels = jax.random.randint(k_lab, (N, H, W), 0, NUM_CLASS, dtype=jnp.int32)

    out = nr_dice_ce_loss(pred, labels, num_class=NUM_CLASS,
                          alpha=ALPHA, beta=BETA, gamma=GAMMA)
    out = jax.tree_util.tree_map(jax.block_until_ready, out)

    ref = _reference(pred, labels, num_class=NUM_CLASS,
                     alpha=ALPHA, beta=BETA, gamma=GAMMA)
    for k in ("ce", "NR_dice", "total"):
        np.testing.assert_allclose(np.asarray(out[k]), np.asarray(ref[k]),
                                   rtol=1e-4, atol=1e-5)

    print("KERNEL_OK")
</pallas_src>

<mosaic_0001>
module attributes {stable_mosaic.version = 11 : i64} {
  func.func @_nr_dice_ce_kernel(%arg0: i32, %arg1: i32, %arg2: memref<1x4x2x128xf32, #tpu.memory_space<vmem>>, %arg3: memref<1x2x128xi32, #tpu.memory_space<vmem>>, %arg4: memref<1x3x128xf32, #tpu.memory_space<vmem>>, %arg5: memref<2x128xf32, #tpu.memory_space<vmem>>, %arg6: memref<2x128xf32, #tpu.memory_space<vmem>>, %arg7: memref<2x128xf32, #tpu.memory_space<vmem>>) attributes {dimension_semantics = [#tpu.dimension_semantics<core_parallel>, #tpu.dimension_semantics<arbitrary>], iteration_bounds = array<i64: 2, 1>, scalar_prefetch = 0 : i64, scratch_operands = 3 : i64, tpu.core_type = #tpu.core_type<tc>, window_params = [{transform_indices = @transform_0, window_bounds = array<i64: 1, 4, 2, 128>}, {transform_indices = @transform_1, window_bounds = array<i64: 1, 2, 128>}, {transform_indices = @transform_2, window_bounds = array<i64: 1, 3, 128>}]} {
    %c0_i32 = arith.constant 0 : i32
    %0 = arith.cmpi eq, %arg1, %c0_i32 : i32
    %1 = arith.extui %0 : i1 to i32
    %c0_i32_0 = arith.constant 0 : i32
    %2 = arith.cmpi ne, %1, %c0_i32_0 : i32
    scf.if %2 {
      %cst_56 = arith.constant 0.000000e+00 : f32
      %119 = vector.broadcast %cst_56 : f32 to vector<2x128xf32>
      %c0_57 = arith.constant 0 : index
      %c0_58 = arith.constant 0 : index
      %120 = vector.load %arg5[%c0_57, %c0_58] : memref<2x128xf32, #tpu.memory_space<vmem>>, vector<2x128xf32>
      tpu.vector_store %arg5[%c0_57, %c0_58], %119 {strides = array<i32>} : memref<2x128xf32, #tpu.memory_space<vmem>>, vector<2x128xf32>,
      %cst_59 = arith.constant 0.000000e+00 : f32
      %121 = vector.broadcast %cst_59 : f32 to vector<2x128xf32>
      %c0_60 = arith.constant 0 : index
      %c0_61 = arith.constant 0 : index
      %122 = vector.load %arg6[%c0_60, %c0_61] : memref<2x128xf32, #tpu.memory_space<vmem>>, vector<2x128xf32>
      tpu.vector_store %arg6[%c0_60, %c0_61], %121 {strides = array<i32>} : memref<2x128xf32, #tpu.memory_space<vmem>>, vector<2x128xf32>,
      %cst_62 = arith.constant 0.000000e+00 : f32
      %123 = vector.broadcast %cst_62 : f32 to vector<2x128xf32>
      %c0_63 = arith.constant 0 : index
      %c0_64 = arith.constant 0 : index
      %124 = vector.load %arg7[%c0_63, %c0_64] : memref<2x128xf32, #tpu.memory_space<vmem>>, vector<2x128xf32>
      tpu.vector_store %arg7[%c0_63, %c0_64], %123 {strides = array<i32>} : memref<2x128xf32, #tpu.memory_space<vmem>>, vector<2x128xf32>,
    } else {
    }
    %c0 = arith.constant 0 : index
    %c0_1 = arith.constant 0 : index
    %c0_2 = arith.constant 0 : index
    %3 = vector.load %arg3[%c0, %c0_1, %c0_2] : memref<1x2x128xi32, #tpu.memory_space<vmem>>, vector<1x2x128xi32>
    %4 = vector.shape_cast %3 : vector<1x2x128xi32> to vector<2x128xi32>
    %c0_3 = arith.constant 0 : index
    %c0_4 = arith.constant 0 : index
    %c0_5 = arith.constant 0 : index
    %c0_6 = arith.constant 0 : index
    %5 = vector.load %arg2[%c0_3, %c0_4, %c0_5, %c0_6] : memref<1x4x2x128xf32, #tpu.memory_space<vmem>>, vector<1x1x2x128xf32>
    %6 = vector.shape_cast %5 : vector<1x1x2x128xf32> to vector<2x128xf32>
    %c0_i32_7 = arith.constant 0 : i32
    %7 = vector.broadcast %c0_i32_7 : i32 to vector<2x128xi32>
    %8 = arith.cmpi eq, %4, %7 : vector<2x128xi32>
    %cst = arith.constant 0.000000e+00 : f32
    %9 = vector.broadcast %cst : f32 to vector<2x128xf32>
    %10 = arith.select %8, %6, %9 : vector<2x128xi1>, vector<2x128xf32>
    %c0_8 = arith.constant 0 : index
    %c1 = arith.constant 1 : index
    %c0_9 = arith.constant 0 : index
    %c0_10 = arith.constant 0 : index
    %11 = vector.load %arg2[%c0_8, %c1, %c0_9, %c0_10] : memref<1x4x2x128xf32, #tpu.memory_space<vmem>>, vector<1x1x2x128xf32>
    %12 = vector.shape_cast %11 : vector<1x1x2x128xf32> to vector<2x128xf32>
    %13 = arith.maximumf %6, %12 : vector<2x128xf32>
    %c1_i32 = arith.constant 1 : i32
    %14 = vector.broadcast %c1_i32 : i32 to vector<2x128xi32>
    %15 = arith.cmpi eq, %4, %14 : vector<2x128xi32>
    %cst_11 = arith.constant 0.000000e+00 : f32
    %16 = vector.broadcast %cst_11 : f32 to vector<2x128xf32>
    %17 = arith.select %15, %12, %16 : vector<2x128xi1>, vector<2x128xf32>
    %18 = arith.addf %10, %17 : vector<2x128xf32>
    %c0_12 = arith.constant 0 : index
    %c2 = arith.constant 2 : index
    %c0_13 = arith.constant 0 : index
    %c0_14 = arith.constant 0 : index
    %19 = vector.load %arg2[%c0_12, %c2, %c0_13, %c0_14] : memref<1x4x2x128xf32, #tpu.memory_space<vmem>>, vector<1x1x2x128xf32>
    %20 = vector.shape_cast %19 : vector<1x1x2x128xf32> to vector<2x128xf32>
    %21 = arith.maximumf %13, %20 : vector<2x128xf32>
    %c2_i32 = arith.constant 2 : i32
    %22 = vector.broadcast %c2_i32 : i32 to vector<2x128xi32>
    %23 = arith.cmpi eq, %4, %22 : vector<2x128xi32>
    %cst_15 = arith.constant 0.000000e+00 : f32
    %24 = vector.broadcast %cst_15 : f32 to vector<2x128xf32>
    %25 = arith.select %23, %20, %24 : vector<2x128xi1>, vector<2x128xf32>
    %26 = arith.addf %18, %25 : vector<2x128xf32>
    %c0_16 = arith.constant 0 : index
    %c3 = arith.constant 3 : index
    %c0_17 = arith.constant 0 : index
    %c0_18 = arith.constant 0 : index
    %27 = vector.load %arg2[%c0_16, %c3, %c0_17, %c0_18] : memref<1x4x2x128xf32, #tpu.memory_space<vmem>>, vector<1x1x2x128xf32>
    %28 = vector.shape_cast %27 : vector<1x1x2x128xf32> to vector<2x128xf32>
    %29 = arith.maximumf %21, %28 : vector<2x128xf32>
    %c3_i32 = arith.constant 3 : i32
    %30 = vector.broadcast %c3_i32 : i32 to vector<2x128xi32>
    %31 = arith.cmpi eq, %4, %30 : vector<2x128xi32>
    %cst_19 = arith.constant 0.000000e+00 : f32
    %32 = vector.broadcast %cst_19 : f32 to vector<2x128xf32>
    %33 = arith.select %31, %28, %32 : vector<2x128xi1>, vector<2x128xf32>
    %34 = arith.addf %26, %33 : vector<2x128xf32>
    %c0_20 = arith.constant 0 : index
    %c0_21 = arith.constant 0 : index
    %c0_22 = arith.constant 0 : index
    %c0_23 = arith.constant 0 : index
    %35 = vector.load %arg2[%c0_20, %c0_21, %c0_22, %c0_23] : memref<1x4x2x128xf32, #tpu.memory_space<vmem>>, vector<1x1x2x128xf32>
    %36 = vector.shape_cast %35 : vector<1x1x2x128xf32> to vector<2x128xf32>
    %37 = arith.subf %36, %29 : vector<2x128xf32>
    %38 = math.exp %37 : vector<2x128xf32>
    %39 = arith.mulf %38, %38 : vector<2x128xf32>
    %c0_24 = arith.constant 0 : index
    %c1_25 = arith.constant 1 : index
    %c0_26 = arith.constant 0 : index
    %c0_27 = arith.constant 0 : index
    %40 = vector.load %arg2[%c0_24, %c1_25, %c0_26, %c0_27] : memref<1x4x2x128xf32, #tpu.memory_space<vmem>>, vector<1x1x2x128xf32>
    %41 = vector.shape_cast %40 : vector<1x1x2x128xf32> to vector<2x128xf32>
    %42 = arith.subf %41, %29 : vector<2x128xf32>
    %43 = math.exp %42 : vector<2x128xf32>
    %44 = arith.addf %38, %43 : vector<2x128xf32>
    %45 = arith.mulf %43, %43 : vector<2x128xf32>
    %46 = arith.addf %39, %45 : vector<2x128xf32>
    %c0_28 = arith.constant 0 : index
    %c2_29 = arith.constant 2 : index
    %c0_30 = arith.constant 0 : index
    %c0_31 = arith.constant 0 : index
    %47 = vector.load %arg2[%c0_28, %c2_29, %c0_30, %c0_31] : memref<1x4x2x128xf32, #tpu.memory_space<vmem>>, vector<1x1x2x128xf32>
    %48 = vector.shape_cast %47 : vector<1x1x2x128xf32> to vector<2x128xf32>
    %49 = arith.subf %48, %29 : vector<2x128xf32>
    %50 = math.exp %49 : vector<2x128xf32>
    %51 = arith.addf %44, %50 : vector<2x128xf32>
    %52 = arith.mulf %50, %50 : vector<2x128xf32>
    %53 = arith.addf %46, %52 : vector<2x128xf32>
    %c0_32 = arith.constant 0 : index
    %c3_33 = arith.constant 3 : index
    %c0_34 = arith.constant 0 : index
    %c0_35 = arith.constant 0 : index
    %54 = vector.load %arg2[%c0_32, %c3_33, %c0_34, %c0_35] : memref<1x4x2x128xf32, #tpu.memory_space<vmem>>, vector<1x1x2x128xf32>
    %55 = vector.shape_cast %54 : vector<1x1x2x128xf32> to vector<2x128xf32>
    %56 = arith.subf %55, %29 : vector<2x128xf32>
    %57 = math.exp %56 : vector<2x128xf32>
    %58 = arith.addf %51, %57 : vector<2x128xf32>
    %59 = arith.mulf %57, %57 : vector<2x128xf32>
    %60 = arith.addf %53, %59 : vector<2x128xf32>
    %61 = arith.subf %29, %34 : vector<2x128xf32>
    %62 = math.log %58 : vector<2x128xf32>
    %63 = arith.addf %61, %62 : vector<2x128xf32>
    %cst_36 = arith.constant 9.99999974E-5 : f32
    %64 = vector.broadcast %cst_36 : f32 to vector<2x128xf32>
    %65 = arith.mulf %58, %64 : vector<2x128xf32>
    %c0_i32_37 = arith.constant 0 : i32
    %66 = vector.broadcast %c0_i32_37 : i32 to vector<2x128xi32>
    %67 = arith.cmpi eq, %4, %66 : vector<2x128xi32>
    %68 = arith.select %67, %58, %65 : vector<2x128xi1>, vector<2x128xf32>
    %69 = arith.subf %38, %68 : vector<2x128xf32>
    %70 = math.absf %69 : vector<2x128xf32>
    %71 = math.sqrt %70 : vector<2x128xf32>
    %72 = arith.mulf %70, %71 : vector<2x128xf32>
    %c1_i32_38 = arith.constant 1 : i32
    %73 = vector.broadcast %c1_i32_38 : i32 to vector<2x128xi32>
    %74 = arith.cmpi eq, %4, %73 : vector<2x128xi32>
    %75 = arith.select %74, %58, %65 : vector<2x128xi1>, vector<2x128xf32>
    %76 = arith.subf %43, %75 : vector<2x128xf32>
    %77 = math.absf %76 : vector<2x128xf32>
    %78 = math.sqrt %77 : vector<2x128xf32>
    %79 = arith.mulf %77, %78 : vector<2x128xf32>
    %80 = arith.addf %72, %79 : vector<2x128xf32>
    %c2_i32_39 = arith.constant 2 : i32
    %81 = vector.broadcast %c2_i32_39 : i32 to vector<2x128xi32>
    %82 = arith.cmpi eq, %4, %81 : vector<2x128xi32>
    %83 = arith.select %82, %58, %65 : vector<2x128xi1>, vector<2x128xf32>
    %84 = arith.subf %50, %83 : vector<2x128xf32>
    %85 = math.absf %84 : vector<2x128xf32>
    %86 = math.sqrt %85 : vector<2x128xf32>
    %87 = arith.mulf %85, %86 : vector<2x128xf32>
    %88 = arith.addf %80, %87 : vector<2x128xf32>
    %c3_i32_40 = arith.constant 3 : i32
    %89 = vector.broadcast %c3_i32_40 : i32 to vector<2x128xi32>
    %90 = arith.cmpi eq, %4, %89 : vector<2x128xi32>
    %91 = arith.select %90, %58, %65 : vector<2x128xi1>, vector<2x128xf32>
    %92 = arith.subf %57, %91 : vector<2x128xf32>
    %93 = math.absf %92 : vector<2x128xf32>
    %94 = math.sqrt %93 : vector<2x128xf32>
    %95 = arith.mulf %93, %94 : vector<2x128xf32>
    %96 = arith.addf %88, %95 : vector<2x128xf32>
    %97 = tpu.reciprocal %58 {approx = true} : vector<2x128xf32> -> vector<2x128xf32>
    %98 = arith.mulf %58, %97 : vector<2x128xf32>
    %cst_41 = arith.constant 2.000000e+00 : f32
    %99 = vector.broadcast %cst_41 : f32 to vector<2x128xf32>
    %100 = arith.subf %99, %98 : vector<2x128xf32>
    %101 = arith.mulf %97, %100 : vector<2x128xf32>
    %102 = math.sqrt %101 : vector<2x128xf32>
    %103 = arith.mulf %101, %102 : vector<2x128xf32>
    %104 = arith.mulf %96, %103 : vector<2x128xf32>
    %105 = arith.mulf %101, %101 : vector<2x128xf32>
    %106 = arith.mulf %60, %105 : vector<2x128xf32>
    %c0_42 = arith.constant 0 : index
    %c0_43 = arith.constant 0 : index
    %107 = vector.load %arg5[%c0_42, %c0_43] : memref<2x128xf32, #tpu.memory_space<vmem>>, vector<2x128xf32>
    %108 = arith.addf %107, %63 : vector<2x128xf32>
    %c0_44 = arith.constant 0 : index
    %c0_45 = arith.constant 0 : index
    %109 = vector.load %arg5[%c0_44, %c0_45] : memref<2x128xf32, #tpu.memory_space<vmem>>, vector<2x128xf32>
    tpu.vector_store %arg5[%c0_44, %c0_45], %108 {strides = array<i32>} : memref<2x128xf32, #tpu.memory_space<vmem>>, vector<2x128xf32>,
    %c0_46 = arith.constant 0 : index
    %c0_47 = arith.constant 0 : index
    %110 = vector.load %arg6[%c0_46, %c0_47] : memref<2x128xf32, #tpu.memory_space<vmem>>, vector<2x128xf32>
    %111 = arith.addf %110, %104 : vector<2x128xf32>
    %c0_48 = arith.constant 0 : index
    %c0_49 = arith.constant 0 : index
    %112 = vector.load %arg6[%c0_48, %c0_49] : memref<2x128xf32, #tpu.memory_space<vmem>>, vector<2x128xf32>
    tpu.vector_store %arg6[%c0_48, %c0_49], %111 {strides = array<i32>} : memref<2x128xf32, #tpu.memory_space<vmem>>, vector<2x128xf32>,
    %c0_50 = arith.constant 0 : index
    %c0_51 = arith.constant 0 : index
    %113 = vector.load %arg7[%c0_50, %c0_51] : memref<2x128xf32, #tpu.memory_space<vmem>>, vector<2x128xf32>
    %114 = arith.addf %113, %106 : vector<2x128xf32>
    %c0_52 = arith.constant 0 : index
    %c0_53 = arith.constant 0 : index
    %115 = vector.load %arg7[%c0_52, %c0_53] : memref<2x128xf32, #tpu.memory_space<vmem>>, vector<2x128xf32>
    tpu.vector_store %arg7[%c0_52, %c0_53], %114 {strides = array<i32>} : memref<2x128xf32, #tpu.memory_space<vmem>>, vector<2x128xf32>,
    %c0_i32_54 = arith.constant 0 : i32
    %116 = arith.cmpi eq, %arg1, %c0_i32_54 : i32
    %117 = arith.extui %116 : i1 to i32
    %c0_i32_55 = arith.constant 0 : i32
    %118 = arith.cmpi ne, %117, %c0_i32_55 : i32
    scf.if %118 {
      %c0_56 = arith.constant 0 : index
      %c0_57 = arith.constant 0 : index
      %119 = vector.load %arg5[%c0_56, %c0_57] : memref<2x128xf32, #tpu.memory_space<vmem>>, vector<2x128xf32>
      %cst_58 = arith.constant dense<0.000000e+00> : vector<128xf32>
      %120 = vector.multi_reduction <add>, %119, %cst_58 [0] : vector<2x128xf32> to vector<128xf32>
      %121 = vector.shape_cast %120 : vector<128xf32> to vector<1x128xf32>
      %c0_59 = arith.constant 0 : index
      %c0_60 = arith.constant 0 : index
      %c0_61 = arith.constant 0 : index
      %122 = vector.load %arg4[%c0_59, %c0_60, %c0_61] : memref<1x3x128xf32, #tpu.memory_space<vmem>>, vector<1x1x128xf32>
      %123 = vector.shape_cast %122 : vector<1x1x128xf32> to vector<1x128xf32>
      %124 = vector.shape_cast %121 : vector<1x128xf32> to vector<1x1x128xf32>
      tpu.vector_store %arg4[%c0_59, %c0_60, %c0_61], %124 {strides = array<i32>} : memref<1x3x128xf32, #tpu.memory_space<vmem>>, vector<1x1x128xf32>,
      %c0_62 = arith.constant 0 : index
      %c0_63 = arith.constant 0 : index
      %125 = vector.load %arg6[%c0_62, %c0_63] : memref<2x128xf32, #tpu.memory_space<vmem>>, vector<2x128xf32>
      %cst_64 = arith.constant dense<0.000000e+00> : vector<128xf32>
      %126 = vector.multi_reduction <add>, %125, %cst_64 [0] : vector<2x128xf32> to vector<128xf32>
      %127 = vector.shape_cast %126 : vector<128xf32> to vector<1x128xf32>
      %c0_65 = arith.constant 0 : index
      %c1_66 = arith.constant 1 : index
      %c0_67 = arith.constant 0 : index
      %128 = vector.load %arg4[%c0_65, %c1_66, %c0_67] : memref<1x3x128xf32, #tpu.memory_space<vmem>>, vector<1x1x128xf32>
      %129 = vector.shape_cast %128 : vector<1x1x128xf32> to vector<1x128xf32>
      %130 = vector.shape_cast %127 : vector<1x128xf32> to vector<1x1x128xf32>
      tpu.vector_store %arg4[%c0_65, %c1_66, %c0_67], %130 {strides = array<i32>} : memref<1x3x128xf32, #tpu.memory_space<vmem>>, vector<1x1x128xf32>,
      %c0_68 = arith.constant 0 : index
      %c0_69 = arith.constant 0 : index
      %131 = vector.load %arg7[%c0_68, %c0_69] : memref<2x128xf32, #tpu.memory_space<vmem>>, vector<2x128xf32>
      %cst_70 = arith.constant dense<0.000000e+00> : vector<128xf32>
      %132 = vector.multi_reduction <add>, %131, %cst_70 [0] : vector<2x128xf32> to vector<128xf32>
      %133 = vector.shape_cast %132 : vector<128xf32> to vector<1x128xf32>
      %c0_71 = arith.constant 0 : index
      %c2_72 = arith.constant 2 : index
      %c0_73 = arith.constant 0 : index
      %134 = vector.load %arg4[%c0_71, %c2_72, %c0_73] : memref<1x3x128xf32, #tpu.memory_space<vmem>>, vector<1x1x128xf32>
      %135 = vector.shape_cast %134 : vector<1x1x128xf32> to vector<1x128xf32>
      %136 = vector.shape_cast %133 : vector<1x128xf32> to vector<1x1x128xf32>
      tpu.vector_store %arg4[%c0_71, %c2_72, %c0_73], %136 {strides = array<i32>} : memref<1x3x128xf32, #tpu.memory_space<vmem>>, vector<1x1x128xf32>,
    } else {
    }
    return
  }
  func.func @transform_0(%arg0: i32, %arg1: i32) -> (i32, i32, i32, i32) {
    %c0_i32 = arith.constant 0 : i32
    %c0_i32_0 = arith.constant 0 : i32
    %c0_i32_1 = arith.constant 0 : i32
    return %arg0, %c0_i32, %arg1, %c0_i32_0 : i32, i32, i32, i32
  }
  func.func @transform_1(%arg0: i32, %arg1: i32) -> (i32, i32, i32) {
    %c0_i32 = arith.constant 0 : i32
    %c0_i32_0 = arith.constant 0 : i32
    return %arg0, %arg1, %c0_i32 : i32, i32, i32
  }
  func.func @transform_2(%arg0: i32, %arg1: i32) -> (i32, i32, i32) {
    %c0_i32 = arith.constant 0 : i32
    %c0_i32_0 = arith.constant 0 : i32
    %c0_i32_1 = arith.constant 0 : i32
    return %arg0, %c0_i32, %c0_i32_0 : i32, i32, i32
  }
}

module attributes {stable_mosaic.version = 11 : i64} {
  func.func @_nr_dice_ce_kernel(%arg0: i32, %arg1: i32, %arg2: memref<1x4x2x128xf32, #tpu.memory_space<vmem>>, %arg3: memref<1x2x128xi32, #tpu.memory_space<vmem>>, %arg4: memref<1x3x128xf32, #tpu.memory_space<vmem>>, %arg5: memref<2x128xf32, #tpu.memory_space<vmem>>, %arg6: memref<2x128xf32, #tpu.memory_space<vmem>>, %arg7: memref<2x128xf32, #tpu.memory_space<vmem>>) attributes {dimension_semantics = [#tpu.dimension_semantics<parallel>, #tpu.dimension_semantics<arbitrary>], iteration_bounds = array<i64: 2, 1>, scalar_prefetch = 0 : i64, scratch_operands = 3 : i64, tpu.core_type = #tpu.core_type<tc>, window_params = [{transform_indices = @transform_0, window_bounds = array<i64: 1, 4, 2, 128>}, {transform_indices = @transform_1, window_bounds = array<i64: 1, 2, 128>}, {transform_indices = @transform_2, window_bounds = array<i64: 1, 3, 128>}]} {
    %c0_i32 = arith.constant 0 : i32
    %0 = arith.cmpi eq, %arg1, %c0_i32 : i32
    %1 = arith.extui %0 : i1 to i32
    %c0_i32_0 = arith.constant 0 : i32
    %2 = arith.cmpi ne, %1, %c0_i32_0 : i32
    scf.if %2 {
      %cst_56 = arith.constant 0.000000e+00 : f32
      %119 = vector.broadcast %cst_56 : f32 to vector<2x128xf32>
      %c0_57 = arith.constant 0 : index
      %c0_58 = arith.constant 0 : index
      %120 = vector.load %arg5[%c0_57, %c0_58] : memref<2x128xf32, #tpu.memory_space<vmem>>, vector<2x128xf32>
      tpu.vector_store %arg5[%c0_57, %c0_58], %119 {strides = array<i32>} : memref<2x128xf32, #tpu.memory_space<vmem>>, vector<2x128xf32>,
      %cst_59 = arith.constant 0.000000e+00 : f32
      %121 = vector.broadcast %cst_59 : f32 to vector<2x128xf32>
      %c0_60 = arith.constant 0 : index
      %c0_61 = arith.constant 0 : index
      %122 = vector.load %arg6[%c0_60, %c0_61] : memref<2x128xf32, #tpu.memory_space<vmem>>, vector<2x128xf32>
      tpu.vector_store %arg6[%c0_60, %c0_61], %121 {strides = array<i32>} : memref<2x128xf32, #tpu.memory_space<vmem>>, vector<2x128xf32>,
      %cst_62 = arith.constant 0.000000e+00 : f32
      %123 = vector.broadcast %cst_62 : f32 to vector<2x128xf32>
      %c0_63 = arith.constant 0 : index
      %c0_64 = arith.constant 0 : index
      %124 = vector.load %arg7[%c0_63, %c0_64] : memref<2x128xf32, #tpu.memory_space<vmem>>, vector<2x128xf32>
      tpu.vector_store %arg7[%c0_63, %c0_64], %123 {strides = array<i32>} : memref<2x128xf32, #tpu.memory_space<vmem>>, vector<2x128xf32>,
    } else {
    }
    %c0 = arith.constant 0 : index
    %c0_1 = arith.constant 0 : index
    %c0_2 = arith.constant 0 : index
    %3 = vector.load %arg3[%c0, %c0_1, %c0_2] : memref<1x2x128xi32, #tpu.memory_space<vmem>>, vector<1x2x128xi32>
    %4 = vector.shape_cast %3 : vector<1x2x128xi32> to vector<2x128xi32>
    %c0_3 = arith.constant 0 : index
    %c0_4 = arith.constant 0 : index
    %c0_5 = arith.constant 0 : index
    %c0_6 = arith.constant 0 : index
    %5 = vector.load %arg2[%c0_3, %c0_4, %c0_5, %c0_6] : memref<1x4x2x128xf32, #tpu.memory_space<vmem>>, vector<1x1x2x128xf32>
    %6 = vector.shape_cast %5 : vector<1x1x2x128xf32> to vector<2x128xf32>
    %c0_i32_7 = arith.constant 0 : i32
    %7 = vector.broadcast %c0_i32_7 : i32 to vector<2x128xi32>
    %8 = arith.cmpi eq, %4, %7 : vector<2x128xi32>
    %cst = arith.constant 0.000000e+00 : f32
    %9 = vector.broadcast %cst : f32 to vector<2x128xf32>
    %10 = arith.select %8, %6, %9 : vector<2x128xi1>, vector<2x128xf32>
    %c0_8 = arith.constant 0 : index
    %c1 = arith.constant 1 : index
    %c0_9 = arith.constant 0 : index
    %c0_10 = arith.constant 0 : index
    %11 = vector.load %arg2[%c0_8, %c1, %c0_9, %c0_10] : memref<1x4x2x128xf32, #tpu.memory_space<vmem>>, vector<1x1x2x128xf32>
    %12 = vector.shape_cast %11 : vector<1x1x2x128xf32> to vector<2x128xf32>
    %13 = arith.maximumf %6, %12 : vector<2x128xf32>
    %c1_i32 = arith.constant 1 : i32
    %14 = vector.broadcast %c1_i32 : i32 to vector<2x128xi32>
    %15 = arith.cmpi eq, %4, %14 : vector<2x128xi32>
    %cst_11 = arith.constant 0.000000e+00 : f32
    %16 = vector.broadcast %cst_11 : f32 to vector<2x128xf32>
    %17 = arith.select %15, %12, %16 : vector<2x128xi1>, vector<2x128xf32>
    %18 = arith.addf %10, %17 : vector<2x128xf32>
    %c0_12 = arith.constant 0 : index
    %c2 = arith.constant 2 : index
    %c0_13 = arith.constant 0 : index
    %c0_14 = arith.constant 0 : index
    %19 = vector.load %arg2[%c0_12, %c2, %c0_13, %c0_14] : memref<1x4x2x128xf32, #tpu.memory_space<vmem>>, vector<1x1x2x128xf32>
    %20 = vector.shape_cast %19 : vector<1x1x2x128xf32> to vector<2x128xf32>
    %21 = arith.maximumf %13, %20 : vector<2x128xf32>
    %c2_i32 = arith.constant 2 : i32
    %22 = vector.broadcast %c2_i32 : i32 to vector<2x128xi32>
    %23 = arith.cmpi eq, %4, %22 : vector<2x128xi32>
    %cst_15 = arith.constant 0.000000e+00 : f32
    %24 = vector.broadcast %cst_15 : f32 to vector<2x128xf32>
    %25 = arith.select %23, %20, %24 : vector<2x128xi1>, vector<2x128xf32>
    %26 = arith.addf %18, %25 : vector<2x128xf32>
    %c0_16 = arith.constant 0 : index
    %c3 = arith.constant 3 : index
    %c0_17 = arith.constant 0 : index
    %c0_18 = arith.constant 0 : index
    %27 = vector.load %arg2[%c0_16, %c3, %c0_17, %c0_18] : memref<1x4x2x128xf32, #tpu.memory_space<vmem>>, vector<1x1x2x128xf32>
    %28 = vector.shape_cast %27 : vector<1x1x2x128xf32> to vector<2x128xf32>
    %29 = arith.maximumf %21, %28 : vector<2x128xf32>
    %c3_i32 = arith.constant 3 : i32
    %30 = vector.broadcast %c3_i32 : i32 to vector<2x128xi32>
    %31 = arith.cmpi eq, %4, %30 : vector<2x128xi32>
    %cst_19 = arith.constant 0.000000e+00 : f32
    %32 = vector.broadcast %cst_19 : f32 to vector<2x128xf32>
    %33 = arith.select %31, %28, %32 : vector<2x128xi1>, vector<2x128xf32>
    %34 = arith.addf %26, %33 : vector<2x128xf32>
    %c0_20 = arith.constant 0 : index
    %c0_21 = arith.constant 0 : index
    %c0_22 = arith.constant 0 : index
    %c0_23 = arith.constant 0 : index
    %35 = vector.load %arg2[%c0_20, %c0_21, %c0_22, %c0_23] : memref<1x4x2x128xf32, #tpu.memory_space<vmem>>, vector<1x1x2x128xf32>
    %36 = vector.shape_cast %35 : vector<1x1x2x128xf32> to vector<2x128xf32>
    %37 = arith.subf %36, %29 : vector<2x128xf32>
    %38 = math.exp %37 : vector<2x128xf32>
    %39 = arith.mulf %38, %38 : vector<2x128xf32>
    %c0_24 = arith.constant 0 : index
    %c1_25 = arith.constant 1 : index
    %c0_26 = arith.constant 0 : index
    %c0_27 = arith.constant 0 : index
    %40 = vector.load %arg2[%c0_24, %c1_25, %c0_26, %c0_27] : memref<1x4x2x128xf32, #tpu.memory_space<vmem>>, vector<1x1x2x128xf32>
    %41 = vector.shape_cast %40 : vector<1x1x2x128xf32> to vector<2x128xf32>
    %42 = arith.subf %41, %29 : vector<2x128xf32>
    %43 = math.exp %42 : vector<2x128xf32>
    %44 = arith.addf %38, %43 : vector<2x128xf32>
    %45 = arith.mulf %43, %43 : vector<2x128xf32>
    %46 = arith.addf %39, %45 : vector<2x128xf32>
    %c0_28 = arith.constant 0 : index
    %c2_29 = arith.constant 2 : index
    %c0_30 = arith.constant 0 : index
    %c0_31 = arith.constant 0 : index
    %47 = vector.load %arg2[%c0_28, %c2_29, %c0_30, %c0_31] : memref<1x4x2x128xf32, #tpu.memory_space<vmem>>, vector<1x1x2x128xf32>
    %48 = vector.shape_cast %47 : vector<1x1x2x128xf32> to vector<2x128xf32>
    %49 = arith.subf %48, %29 : vector<2x128xf32>
    %50 = math.exp %49 : vector<2x128xf32>
    %51 = arith.addf %44, %50 : vector<2x128xf32>
    %52 = arith.mulf %50, %50 : vector<2x128xf32>
    %53 = arith.addf %46, %52 : vector<2x128xf32>
    %c0_32 = arith.constant 0 : index
    %c3_33 = arith.constant 3 : index
    %c0_34 = arith.constant 0 : index
    %c0_35 = arith.constant 0 : index
    %54 = vector.load %arg2[%c0_32, %c3_33, %c0_34, %c0_35] : memref<1x4x2x128xf32, #tpu.memory_space<vmem>>, vector<1x1x2x128xf32>
    %55 = vector.shape_cast %54 : vector<1x1x2x128xf32> to vector<2x128xf32>
    %56 = arith.subf %55, %29 : vector<2x128xf32>
    %57 = math.exp %56 : vector<2x128xf32>
    %58 = arith.addf %51, %57 : vector<2x128xf32>
    %59 = arith.mulf %57, %57 : vector<2x128xf32>
    %60 = arith.addf %53, %59 : vector<2x128xf32>
    %61 = arith.subf %29, %34 : vector<2x128xf32>
    %62 = math.log %58 : vector<2x128xf32>
    %63 = arith.addf %61, %62 : vector<2x128xf32>
    %cst_36 = arith.constant 9.99999974E-5 : f32
    %64 = vector.broadcast %cst_36 : f32 to vector<2x128xf32>
    %65 = arith.mulf %58, %64 : vector<2x128xf32>
    %c0_i32_37 = arith.constant 0 : i32
    %66 = vector.broadcast %c0_i32_37 : i32 to vector<2x128xi32>
    %67 = arith.cmpi eq, %4, %66 : vector<2x128xi32>
    %68 = arith.select %67, %58, %65 : vector<2x128xi1>, vector<2x128xf32>
    %69 = arith.subf %38, %68 : vector<2x128xf32>
    %70 = math.absf %69 : vector<2x128xf32>
    %71 = math.sqrt %70 : vector<2x128xf32>
    %72 = arith.mulf %70, %71 : vector<2x128xf32>
    %c1_i32_38 = arith.constant 1 : i32
    %73 = vector.broadcast %c1_i32_38 : i32 to vector<2x128xi32>
    %74 = arith.cmpi eq, %4, %73 : vector<2x128xi32>
    %75 = arith.select %74, %58, %65 : vector<2x128xi1>, vector<2x128xf32>
    %76 = arith.subf %43, %75 : vector<2x128xf32>
    %77 = math.absf %76 : vector<2x128xf32>
    %78 = math.sqrt %77 : vector<2x128xf32>
    %79 = arith.mulf %77, %78 : vector<2x128xf32>
    %80 = arith.addf %72, %79 : vector<2x128xf32>
    %c2_i32_39 = arith.constant 2 : i32
    %81 = vector.broadcast %c2_i32_39 : i32 to vector<2x128xi32>
    %82 = arith.cmpi eq, %4, %81 : vector<2x128xi32>
    %83 = arith.select %82, %58, %65 : vector<2x128xi1>, vector<2x128xf32>
    %84 = arith.subf %50, %83 : vector<2x128xf32>
    %85 = math.absf %84 : vector<2x128xf32>
    %86 = math.sqrt %85 : vector<2x128xf32>
    %87 = arith.mulf %85, %86 : vector<2x128xf32>
    %88 = arith.addf %80, %87 : vector<2x128xf32>
    %c3_i32_40 = arith.constant 3 : i32
    %89 = vector.broadcast %c3_i32_40 : i32 to vector<2x128xi32>
    %90 = arith.cmpi eq, %4, %89 : vector<2x128xi32>
    %91 = arith.select %90, %58, %65 : vector<2x128xi1>, vector<2x128xf32>
    %92 = arith.subf %57, %91 : vector<2x128xf32>
    %93 = math.absf %92 : vector<2x128xf32>
    %94 = math.sqrt %93 : vector<2x128xf32>
    %95 = arith.mulf %93, %94 : vector<2x128xf32>
    %96 = arith.addf %88, %95 : vector<2x128xf32>
    %97 = tpu.reciprocal %58 {approx = true} : vector<2x128xf32> -> vector<2x128xf32>
    %98 = arith.mulf %58, %97 : vector<2x128xf32>
    %cst_41 = arith.constant 2.000000e+00 : f32
    %99 = vector.broadcast %cst_41 : f32 to vector<2x128xf32>
    %100 = arith.subf %99, %98 : vector<2x128xf32>
    %101 = arith.mulf %97, %100 : vector<2x128xf32>
    %102 = math.sqrt %101 : vector<2x128xf32>
    %103 = arith.mulf %101, %102 : vector<2x128xf32>
    %104 = arith.mulf %96, %103 : vector<2x128xf32>
    %105 = arith.mulf %101, %101 : vector<2x128xf32>
    %106 = arith.mulf %60, %105 : vector<2x128xf32>
    %c0_42 = arith.constant 0 : index
    %c0_43 = arith.constant 0 : index
    %107 = vector.load %arg5[%c0_42, %c0_43] : memref<2x128xf32, #tpu.memory_space<vmem>>, vector<2x128xf32>
    %108 = arith.addf %107, %63 : vector<2x128xf32>
    %c0_44 = arith.constant 0 : index
    %c0_45 = arith.constant 0 : index
    %109 = vector.load %arg5[%c0_44, %c0_45] : memref<2x128xf32, #tpu.memory_space<vmem>>, vector<2x128xf32>
    tpu.vector_store %arg5[%c0_44, %c0_45], %108 {strides = array<i32>} : memref<2x128xf32, #tpu.memory_space<vmem>>, vector<2x128xf32>,
    %c0_46 = arith.constant 0 : index
    %c0_47 = arith.constant 0 : index
    %110 = vector.load %arg6[%c0_46, %c0_47] : memref<2x128xf32, #tpu.memory_space<vmem>>, vector<2x128xf32>
    %111 = arith.addf %110, %104 : vector<2x128xf32>
    %c0_48 = arith.constant 0 : index
    %c0_49 = arith.constant 0 : index
    %112 = vector.load %arg6[%c0_48, %c0_49] : memref<2x128xf32, #tpu.memory_space<vmem>>, vector<2x128xf32>
    tpu.vector_store %arg6[%c0_48, %c0_49], %111 {strides = array<i32>} : memref<2x128xf32, #tpu.memory_space<vmem>>, vector<2x128xf32>,
    %c0_50 = arith.constant 0 : index
    %c0_51 = arith.constant 0 : index
    %113 = vector.load %arg7[%c0_50, %c0_51] : memref<2x128xf32, #tpu.memory_space<vmem>>, vector<2x128xf32>
    %114 = arith.addf %113, %106 : vector<2x128xf32>
    %c0_52 = arith.constant 0 : index
    %c0_53 = arith.constant 0 : index
    %115 = vector.load %arg7[%c0_52, %c0_53] : memref<2x128xf32, #tpu.memory_space<vmem>>, vector<2x128xf32>
    tpu.vector_store %arg7[%c0_52, %c0_53], %114 {strides = array<i32>} : memref<2x128xf32, #tpu.memory_space<vmem>>, vector<2x128xf32>,
    %c0_i32_54 = arith.constant 0 : i32
    %116 = arith.cmpi eq, %arg1, %c0_i32_54 : i32
    %117 = arith.extui %116 : i1 to i32
    %c0_i32_55 = arith.constant 0 : i32
    %118 = arith.cmpi ne, %117, %c0_i32_55 : i32
    scf.if %118 {
      %c0_56 = arith.constant 0 : index
      %c0_57 = arith.constant 0 : index
      %119 = vector.load %arg5[%c0_56, %c0_57] : memref<2x128xf32, #tpu.memory_space<vmem>>, vector<2x128xf32>
      %cst_58 = arith.constant dense<0.000000e+00> : vector<128xf32>
      %120 = vector.multi_reduction <add>, %119, %cst_58 [0] : vector<2x128xf32> to vector<128xf32>
      %121 = vector.shape_cast %120 : vector<128xf32> to vector<1x128xf32>
      %c0_59 = arith.constant 0 : index
      %c0_60 = arith.constant 0 : index
      %c0_61 = arith.constant 0 : index
      %122 = vector.load %arg4[%c0_59, %c0_60, %c0_61] : memref<1x3x128xf32, #tpu.memory_space<vmem>>, vector<1x1x128xf32>
      %123 = vector.shape_cast %122 : vector<1x1x128xf32> to vector<1x128xf32>
      %124 = vector.shape_cast %121 : vector<1x128xf32> to vector<1x1x128xf32>
      tpu.vector_store %arg4[%c0_59, %c0_60, %c0_61], %124 {strides = array<i32>} : memref<1x3x128xf32, #tpu.memory_space<vmem>>, vector<1x1x128xf32>,
      %c0_62 = arith.constant 0 : index
      %c0_63 = arith.constant 0 : index
      %125 = vector.load %arg6[%c0_62, %c0_63] : memref<2x128xf32, #tpu.memory_space<vmem>>, vector<2x128xf32>
      %cst_64 = arith.constant dense<0.000000e+00> : vector<128xf32>
      %126 = vector.multi_reduction <add>, %125, %cst_64 [0] : vector<2x128xf32> to vector<128xf32>
      %127 = vector.shape_cast %126 : vector<128xf32> to vector<1x128xf32>
      %c0_65 = arith.constant 0 : index
      %c1_66 = arith.constant 1 : index
      %c0_67 = arith.constant 0 : index
      %128 = vector.load %arg4[%c0_65, %c1_66, %c0_67] : memref<1x3x128xf32, #tpu.memory_space<vmem>>, vector<1x1x128xf32>
      %129 = vector.shape_cast %128 : vector<1x1x128xf32> to vector<1x128xf32>
      %130 = vector.shape_cast %127 : vector<1x128xf32> to vector<1x1x128xf32>
      tpu.vector_store %arg4[%c0_65, %c1_66, %c0_67], %130 {strides = array<i32>} : memref<1x3x128xf32, #tpu.memory_space<vmem>>, vector<1x1x128xf32>,
      %c0_68 = arith.constant 0 : index
      %c0_69 = arith.constant 0 : index
      %131 = vector.load %arg7[%c0_68, %c0_69] : memref<2x128xf32, #tpu.memory_space<vmem>>, vector<2x128xf32>
      %cst_70 = arith.constant dense<0.000000e+00> : vector<128xf32>
      %132 = vector.multi_reduction <add>, %131, %cst_70 [0] : vector<2x128xf32> to vector<128xf32>
      %133 = vector.shape_cast %132 : vector<128xf32> to vector<1x128xf32>
      %c0_71 = arith.constant 0 : index
      %c2_72 = arith.constant 2 : index
      %c0_73 = arith.constant 0 : index
      %134 = vector.load %arg4[%c0_71, %c2_72, %c0_73] : memref<1x3x128xf32, #tpu.memory_space<vmem>>, vector<1x1x128xf32>
      %135 = vector.shape_cast %134 : vector<1x1x128xf32> to vector<1x128xf32>
      %136 = vector.shape_cast %133 : vector<1x128xf32> to vector<1x1x128xf32>
      tpu.vector_store %arg4[%c0_71, %c2_72, %c0_73], %136 {strides = array<i32>} : memref<1x3x128xf32, #tpu.memory_space<vmem>>, vector<1x1x128xf32>,
    } else {
    }
    return
  }
  func.func @transform_0(%arg0: i32, %arg1: i32) -> (i32, i32, i32, i32) {
    %c0_i32 = arith.constant 0 : i32
    %c0_i32_0 = arith.constant 0 : i32
    %c0_i32_1 = arith.constant 0 : i32
    return %arg0, %c0_i32, %arg1, %c0_i32_0 : i32, i32, i32, i32
  }
  func.func @transform_1(%arg0: i32, %arg1: i32) -> (i32, i32, i32) {
    %c0_i32 = arith.constant 0 : i32
    %c0_i32_0 = arith.constant 0 : i32
    return %arg0, %arg1, %c0_i32 : i32, i32, i32
  }
  func.func @transform_2(%arg0: i32, %arg1: i32) -> (i32, i32, i32) {
    %c0_i32 = arith.constant 0 : i32
    %c0_i32_0 = arith.constant 0 : i32
    %c0_i32_1 = arith.constant 0 : i32
    return %arg0, %c0_i32, %c0_i32_0 : i32, i32, i32
  }
}

</mosaic_0001>

<bundles_post_ra>
// kernel: tpu_custom_call.1
= control target key start
LH: loop header
LB: loop body
LE: loop exit
PB: predicated region body
PF: predicated region fallthrough
CT: control target
= control target key end

     0   :  { %7 = vsyncpa [#allocation6], 0  ;;  %s931_s0 = inlined_call_operand.hbm [shape: f32[2,4,2,128], index: 0, kind: input, shape index: {}]   ;;  %s932_s1 = inlined_call_operand.hbm [shape: s32[2,2,128], index: 1, kind: input, shape index: {}]   ;;  %s933_s2 = inlined_call_operand.vmem [shape: f32[2,3,128], index: 2, kind: output, shape index: {}]  }
   0x1   :  { %9 = vsyncpa [#allocation6 + $0x1], 0 }
   0x2   :  { %10 = vsyncpa [#allocation8], 0 }
   0x3   :  { %12 = vsyncpa [#allocation8 + $0x1], 0  ;;  %s741_s9 = smov 0   ;;  %s743_s10 = smov 0  }
   0x4   :  { %s745_s11 = smov 0   ;;  %s747_s12 = smov 0  }
   0x5   :  { %s749_s13 = smov 0   ;;  %s751_s14 = smov 0  }
   0x6 LB: > { %s503_s15 = sadd.s32 4294967295, %s721_s14   ;;  %s30_s16 = sadd.s32 1, %s717_s13  ;;  %s721_s14 = sphi %s751_s14, %s18_s14   ;;  %s717_s13 = sphi %s749_s13, %s941_s13   ;;  %s713_s12 = sphi %s747_s12, %s940_s12   ;;  %s709_s11 = sphi %s745_s11, %s939_s11   ;;  %s705_s10 = sphi %s743_s10, %s938_s10   ;;  %s701_s9 = sphi %s741_s9, %s937_s9  }
   0x7   : > { %p32_p0 = scmp.ge.s32.totalorder %s30_s16, 2  ;;  %s39_s17 = sadd.s32 1, %s709_s11 }
   0x8   : > { %p46_p1 = scmp.ne.s32.totalorder %s709_s11, %s705_s10  ;;  %p47_p2 = scmp.eq.s32.totalorder %s721_s14, 0 }
   0x9   : > { %s943_s16 = smov (%p32_p0, %s30_s16), 0  ;;  %p52_p4 = scmp.ne.s32.totalorder %s705_s10, %s701_s9 }
   0xa   : > { %p777_p3 = por %p47_p2, %p46_p1  ;;  %s34_s19 = ssub.s32 %s717_s13, %s943_s16 }
   0xb   : > { %p53_p5 = scmp.eq.s32.totalorder %s503_s15, 0  ;;  %p37_p6 = scmp.eq.s32.totalorder %s34_s19, 0 }
   0xc   : > { %p533_p8 = scmp.lt.s32.totalorder %s721_s14, 2  ;;  %s130_s22 = sand.u32 1, %s709_s11  }
   0xd   : > { %p784_p7 = por %p53_p5, %p52_p4  ;;  %s521_s23 = sshll.u32 %s717_s13, 3 }
   0xe   : > { %s790_s21 = scalar_select %p37_p6, %s709_s11, %s39_s17  }
   0xf   : > { %s507_s24 = sshll.u32 %s130_s22, 3  ;;  %s140_s27 = scalar_lea.hbm %s931_s0, %s521_s23 }
  0x10   : > { %s141_s28 = sshll.u32 %s140_s27, 4  ;;  %s134_s29 = scalar_lea.vmem [#allocation5], %s507_s24  ;;  %s142_s28 = int_to_ptr.hbm [resolvable:$true] %s141_s28 }
  0x11   : > { %s143_s30 = sshll.u32 %s134_s29, 4  ;;  %p799_p9 = pnand %p533_p8, %p777_p3  ;;  %s144_s30 = int_to_ptr.vmem [resolvable:$true] %s143_s30 }
  0x12   : > { %p512_p10 = scmp.ge.s32.totalorder %s721_s14, 1  ;;  %p171_p11 = scmp.lt.s32.totalorder %s721_s14, 3 }
  0x13   : > { %s131_s4 = scalar_lea.sflag [#allocation6], %s130_s22  ;;  %s723_s5 = smov 32  }
  0x14   : > { %s724_s6 = smov 2   ;;  %p172_p12 = pnand %p512_p10, %p171_p11 }
  0x15   : > { %529 = dma.hbm_to_vmem [thread:$0]  (!%p799_p9), %s142_s28, 128, %s144_s30, %s131_s4, %s723_s5, %s723_s5, %s724_s6  }
  0x16   : > { %s510_s7 = sshll.u32 %s130_s22, 1  ;;  %s511_s8 = sshll.u32 %s717_s13, 1 }
  0x17   : > { %s162_s17 = scalar_lea.hbm %s932_s1, %s511_s8  ;;  %s157_s19 = scalar_lea.vmem [#allocation7], %s510_s7 }
  0x18   : > { %s164_s18 = sshll.u32 %s162_s17, 4  ;;  %s166_s23 = sshll.u32 %s157_s19, 4  ;;  %s165_s18 = int_to_ptr.hbm [resolvable:$true] %s164_s18  ;;  %s167_s23 = int_to_ptr.vmem [resolvable:$true] %s166_s23 }
  0x19   : > { %s154_s24 = scalar_lea.sflag [#allocation8], %s130_s22  ;;  %175 = sbr.rel (%p172_p12) target bundleno = 122 (0x7a), region = 28 }
  0x1a   : > { %532 = dma.hbm_to_vmem [thread:$0]  (!%p799_p9), %s165_s18, 32, %s167_s23, %s154_s24  }
  0x1b   : > { %s177_s25 = sand.u32 (!%p172_p12), 1, %s705_s10  }
  0x1c   : > { %s513_s26 = sshll.u32 (!%p172_p12), %s177_s25, 3  ;;  %s178_s27 = scalar_lea.sflag (!%p172_p12), [#allocation6], %s177_s25 }
  0x1d   : > { %s181_s28 = scalar_lea.vmem (!%p172_p12), [#allocation5], %s513_s26 }
  0x1e   : > { %692 = dma.done.wait (%p784_p7), %s178_s27, 128  }
  0x1f   : > { %694 = vsyncadd (%p784_p7), %s178_s27, 4294967168  ;;  %s514_s29 = sshll.u32 %s177_s25, 1  ;;  %s188_s30 = scalar_lea.sflag [#allocation8], %s177_s25 }
  0x20   : > { %s191_s4 = scalar_lea.vmem [#allocation7], %s514_s29 }
  0x21   : > { %696 = dma.done.wait (%p784_p7), %s188_s30, 32  }
  0x22   : > { %698 = vsyncadd (%p784_p7), %s188_s30, 4294967264  ;;  %v725_v0 = vmov 0.0   ;;  %v229_v1 = vld [vmem:[%s181_s28] sm:$0x3]  ;;  %v516_v2 = vld [vmem:[%s181_s28 + $0x2] sm:$0x3] }
  0x23   : > { %225 = vst [vmem:[#allocation2] sm:$0x3] %v725_v0  ;;  %v234_v3 = vmax.f32 %v229_v1, %v516_v2  ;;  %v517_v4 = vld [vmem:[%s181_s28 + $0x4] sm:$0x3]  ;;  %v518_v5 = vld [vmem:[%s181_s28 + $0x6] sm:$0x3] }
  0x24   : > { %226 = vst [vmem:[#allocation3] sm:$0x3] %v725_v0  ;;  %v228_v16 = vld [vmem:[%s191_s4] sm:$0x3]  ;;  %vm377_vm8 = vcmask 1041408   ;;  %p217_p13 = scmp.lt.s32.totalorder %s713_s12, 1 }
  0x25   : > { %227 = vst [vmem:[#allocation4] sm:$0x3] %v725_v0  ;;  %v240_v6 = vmax.f32 %v234_v3, %v517_v4  ;;  %vm230_vm0 = vcmp.eq.s32.totalorder %v228_v16, 0  ;;  %vm235_vm1 = vcmp.eq.s32.totalorder %v228_v16, 1  ;;  %vm241_vm2 = vcmp.eq.s32.totalorder %v228_v16, 2 }
  0x26   : > { %v231_v17 = vsel %vm230_vm0, %v229_v1, 0.0  ;;  %v236_v18 = vsel %vm235_vm1, %v516_v2, 0.0  ;;  %v242_v23 = vsel %vm241_vm2, %v517_v4, 0.0  ;;  %vm247_vm3 = vcmp.eq.s32.totalorder %v228_v16, 3  ;;  %s945_s12 = smov (!%p217_p13, %s713_s12), 1 }
  0x27   : > { %v246_v7 = vmax.f32 %v240_v6, %v518_v5  ;;  %v237_v21 = vadd.f32 %v236_v18, %v231_v17  ;;  %v248_v28 = vsel %vm247_vm3, %v518_v5, 0.0  ;;  %s515_s20 = sshll.u32 %s945_s12, 2 }
  0x28   : > { %s220_s3 = scalar_lea.vmem %s933_s2, %s515_s20 }
  0x29   : > { %v250_v8 = vsub.f32 %v229_v1, %v246_v7  ;;  %v254_v9 = vsub.f32 %v516_v2, %v246_v7  ;;  %v260_v10 = vsub.f32 %v517_v4, %v246_v7  ;;  %v266_v11 = vsub.f32 %v518_v5, %v246_v7 }
  0x2a   : > { %v243_v27 = vadd.f32 %v242_v23, %v237_v21  ;;  %v364_v52 = vld [vmem:[#allocation2] sm:$0x3] }
  0x2b   : > { %v251_v12 = vmul.f32 1.442695, %v250_v8  ;;  %v255_v13 = vmul.f32 1.442695, %v254_v9  ;;  %v261_v14 = vmul.f32 1.442695, %v260_v10 }
  0x2c   : > { %v267_v15 = vmul.f32 1.442695, %v266_v11  ;;  %v249_v33 = vadd.f32 %v248_v28, %v243_v27  ;;  %v370_v2 = vld [vmem:[#allocation4] sm:$0x3] }
  0x2d   : > { %585 = vpow2.f32 %v251_v12 }
  0x2e   : > { %587 = vpow2.f32 %v255_v13  ;;  %v272_v44 = vsub.f32 %v246_v7, %v249_v33 }
  0x2f   : > { %589 = vpow2.f32 %v261_v14 }
  0x30   : > { %591 = vpow2.f32 %v267_v15 }
  0x33   : > { %v586_v19 = vpop.eup %585 }
  0x34   : > { %v588_v20 = vpop.eup %587  ;;  %v253_v31 = vmul.f32 %v586_v19, %v586_v19 }
  0x35   : > { %v590_v22 = vpop.eup %589  ;;  %v257_v24 = vadd.f32 %v588_v20, %v586_v19  ;;  %v258_v32 = vmul.f32 %v588_v20, %v588_v20 }
  0x36   : > { %v592_v25 = vpop.eup %591  ;;  %v264_v43 = vmul.f32 %v590_v22, %v590_v22 }
  0x37   : > { %v263_v26 = vadd.f32 %v590_v22, %v257_v24  ;;  %v259_v42 = vadd.f32 %v258_v32, %v253_v31  ;;  %v270_v54 = vmul.f32 %v592_v25, %v592_v25 }
  0x39   : > { %v269_v29 = vadd.f32 %v592_v25, %v263_v26  ;;  %v265_v53 = vadd.f32 %v264_v43, %v259_v42 }
  0x3b   : > { %593 = vlog2.f32 %v269_v29  ;;  %v276_v30 = vmul.f32 0.0001, %v269_v29  ;;  %v271_v59 = vadd.f32 %v270_v54, %v265_v53 }
  0x3c   : > { %595 = vrcp.f32 %v269_v29 }
  0x3d   : > { %v277_v34 = vsel %vm230_vm0, %v269_v29, %v276_v30  ;;  %v293_v35 = vsel %vm235_vm1, %v269_v29, %v276_v30  ;;  %v310_v36 = vsel %vm241_vm2, %v269_v29, %v276_v30  ;;  %v327_v37 = vsel %vm247_vm3, %v269_v29, %v276_v30 }
  0x3e   : > { %v278_v38 = vsub.f32 %v586_v19, %v277_v34  ;;  %v294_v39 = vsub.f32 %v588_v20, %v293_v35  ;;  %v311_v40 = vsub.f32 %v590_v22, %v310_v36  ;;  %v328_v41 = vsub.f32 %v592_v25, %v327_v37 }
  0x40   : > { %v828_v45 = vand.u32 2147483647, %v278_v38  ;;  %v830_v46 = vand.u32 2147483647, %v294_v39  ;;  %v832_v47 = vand.u32 2147483647, %v311_v40 }
  0x41   : > { %v594_v48 = vpop.eup %593  ;;  %v834_v51 = vand.u32 2147483647, %v328_v41 }
  0x42   : > { %v596_v49 = vpop.eup %595  ;;  %v274_v50 = vmul.f32 0.6931472, %v594_v48  ;;  %597 = vrsqrt.f32 %v828_v45  ;;  %vm287_vm4 = vcmp.eq.f32.partialorder %v828_v45, inf  ;;  %vm289_vm5 = vcmp.eq.f32.partialorder %v828_v45, 0.0 }
  0x43   : > { %v345_v55 = vmul.f32 %v596_v49, %v269_v29  ;;  %599 = vrsqrt.f32 %v830_v46  ;;  %v290_v6 = vand.u32 2147483648, %v828_v45  ;;  %vm303_vm6 = vcmp.eq.f32.partialorder %v830_v46, inf }
  0x44   : > { %v275_v56 = vadd.f32 %v274_v50, %v272_v44  ;;  %601 = vrsqrt.f32 %v832_v47  ;;  %vm305_vm7 = vcmp.eq.f32.partialorder %v830_v46, 0.0  ;;  %v306_v15 = vand.u32 2147483648, %v830_v46 }
  0x45   : > { %v346_v57 = vsub.f32 2.0, %v345_v55  ;;  %603 = vrsqrt.f32 %v834_v51  ;;  %vm320_vm9 = vcmp.eq.f32.partialorder %v832_v47, inf  ;;  %vm322_vm10 = vcmp.eq.f32.partialorder %v832_v47, 0.0 }
  0x46   : > { %v365_v58 = vadd.f32 %v364_v52, %v275_v56  ;;  %v323_v22 = vand.u32 2147483648, %v832_v47  ;;  %vm337_vm11 = vcmp.eq.f32.partialorder %v834_v51, inf  ;;  %vm339_vm12 = vcmp.eq.f32.partialorder %v834_v51, 0.0 }
  0x47   : > { %v840_v60 = vmul.f32 %v596_v49, %v346_v57  ;;  %v340_v36 = vand.u32 2147483648, %v834_v51 }
  0x48   : > { %v598_v61 = vpop.eup %597  ;;  %366 = vst [vmem:[#allocation2] sm:$0x3] %v365_v58 }
  0x49   : > { %v600_v62 = vpop.eup %599  ;;  %v362_v63 = vmul.f32 %v840_v60, %v840_v60  ;;  %v281_v0 = vmul.f32 %v598_v61, %v828_v45  ;;  %605 = vrsqrt.f32 %v840_v60  ;;  %vm355_vm13 = vcmp.eq.f32.partialorder %v840_v60, inf }
  0x4a   : > { %v602_v1 = vpop.eup %601  ;;  %v297_v3 = vmul.f32 %v600_v62, %v830_v46  ;;  %vm357_vm14 = vcmp.eq.f32.partialorder %v840_v60, 0.0 }
  0x4b   : > { %v363_v4 = vmul.f32 %v362_v63, %v271_v59  ;;  %v282_v5 = vmul.f32 %v598_v61, %v281_v0  ;;  %v314_v7 = vmul.f32 %v602_v1, %v832_v47  ;;  %v604_v8 = vpop.eup %603  ;;  %v358_v59 = vand.u32 2147483648, %v840_v60 }
  0x4c   : > { %v298_v9 = vmul.f32 %v600_v62, %v297_v3  ;;  %v331_v13 = vmul.f32 %v604_v8, %v834_v51 }
  0x4d   : > { %v371_v10 = vadd.f32 %v370_v2, %v363_v4  ;;  %v283_v11 = vmul.f32 0.5, %v282_v5  ;;  %v315_v12 = vmul.f32 %v602_v1, %v314_v7 }
  0x4e   : > { %v299_v14 = vmul.f32 0.5, %v298_v9  ;;  %v332_v19 = vmul.f32 %v604_v8, %v331_v13 }
  0x4f   : > { %v606_v16 = vpop.eup %605  ;;  %372 = vst [vmem:[#allocation4] sm:$0x3] %v371_v10  ;;  %v284_v17 = vsub.f32 1.5, %v283_v11  ;;  %v316_v18 = vmul.f32 0.5, %v315_v12  ;;  %v376_v20 = vld [vmem:[#allocation2] sm:$0x3] }
  0x50   : > { %v300_v21 = vsub.f32 1.5, %v299_v14  ;;  %v349_v23 = vmul.f32 %v606_v16, %v840_v60  ;;  %v378_v24 = vsel %vm377_vm8, %v376_v20, 0.0  ;;  %v333_v27 = vmul.f32 0.5, %v332_v19 }
  0x51   : > { %v285_v25 = vmul.f32 %v598_v61, %v284_v17  ;;  %v317_v26 = vsub.f32 1.5, %v316_v18  ;;  %v379_v28 = vrot.slane %v378_v24, 4 }
  0x52   : > { %v301_v29 = vmul.f32 %v600_v62, %v300_v21  ;;  %v350_v30 = vmul.f32 %v606_v16, %v349_v23  ;;  %v334_v33 = vsub.f32 1.5, %v333_v27 }
  0x53   : > { %v286_v31 = vmul.f32 %v285_v25, %v828_v45  ;;  %v318_v32 = vmul.f32 %v602_v1, %v317_v26  ;;  %v380_v34 = vadd.f32 %v379_v28, %v378_v24 }
  0x54   : > { %v302_v35 = vmul.f32 %v301_v29, %v830_v46  ;;  %v351_v37 = vmul.f32 0.5, %v350_v30  ;;  %v335_v40 = vmul.f32 %v604_v8, %v334_v33 }
  0x55   : > { %v288_v38 = vsel %vm287_vm4, %v828_v45, %v286_v31  ;;  %v319_v39 = vmul.f32 %v318_v32, %v832_v47  ;;  %v381_v41 = vrot.slane %v380_v34, 2 }
  0x56   : > { %v291_v42 = vsel %vm289_vm5, %v290_v6, %v288_v38  ;;  %v304_v43 = vsel %vm303_vm6, %v830_v46, %v302_v35  ;;  %v352_v44 = vsub.f32 1.5, %v351_v37  ;;  %v395_v48 = vld [vmem:[#allocation4] sm:$0x3]  ;;  %v336_v53 = vmul.f32 %v335_v40, %v834_v51 }
  0x57   : > { %v292_v49 = vmul.f32 %v291_v42, %v828_v45  ;;  %v307_v50 = vsel %vm305_vm7, %v306_v15, %v304_v43  ;;  %v321_v52 = vsel %vm320_vm9, %v832_v47, %v319_v39  ;;  %v382_v57 = vadd.f32 %v381_v41, %v380_v34 }
  0x58   : > { %v308_v54 = vmul.f32 %v307_v50, %v830_v46  ;;  %v324_v55 = vsel %vm322_vm10, %v323_v22, %v321_v52  ;;  %v353_v56 = vmul.f32 %v606_v16, %v352_v44  ;;  %v338_v45 = vsel %vm337_vm11, %v834_v51, %v336_v53 }
  0x59   : > { %v325_v58 = vmul.f32 %v324_v55, %v832_v47  ;;  %v396_v61 = vsel %vm377_vm8, %v395_v48, 0.0  ;;  %v341_v46 = vsel %vm339_vm12, %v340_v36, %v338_v45  ;;  %v383_v0 = vrot.slane %v382_v57, 1 }
  0x5a   : > { %v309_v62 = vadd.f32 %v308_v54, %v292_v49  ;;  %v354_v63 = vmul.f32 %v353_v56, %v840_v60  ;;  %v342_v1 = vmul.f32 %v341_v46, %v834_v51  ;;  %v397_v47 = vrot.slane %v396_v61, 4  ;;  %v367_v51 = vld [vmem:[#allocation3] sm:$0x3] }
  0x5b   : > { %v384_v4 = vadd.f32 %v383_v0, %v382_v57 }
  0x5c   : > { %v326_v2 = vadd.f32 %v325_v58, %v309_v62  ;;  %v356_v3 = vsel %vm355_vm13, %v840_v60, %v354_v63  ;;  %v398_v6 = vadd.f32 %v397_v47, %v396_v61 }
  0x5d   : > { %v359_v5 = vsel %vm357_vm14, %v358_v59, %v356_v3  ;;  %385 = vst [vmem:[%s220_s3] sm:$0x1] %v384_v4 }
  0x5e   : > { %v343_v7 = vadd.f32 %v342_v1, %v326_v2  ;;  %v360_v8 = vmul.f32 %v359_v5, %v840_v60  ;;  %v399_v9 = vrot.slane %v398_v6, 2 }
  0x60   : > { %v361_v10 = vmul.f32 %v360_v8, %v343_v7  ;;  %v400_v11 = vadd.f32 %v399_v9, %v398_v6 }
  0x62   : > { %v368_v12 = vadd.f32 %v367_v51, %v361_v10  ;;  %v401_v13 = vrot.slane %v400_v11, 1 }
  0x64   : > { %369 = vst [vmem:[#allocation3] sm:$0x3] %v368_v12  ;;  %v402_v14 = vadd.f32 %v401_v13, %v400_v11 }
  0x66   : > { %403 = vst [vmem:[%s220_s3 + $0x2] sm:$0x1] %v402_v14 }
  0x6b   : > { %v386_v15 = vld [vmem:[#allocation3] sm:$0x3] }
  0x6c   : > { %v387_v16 = vsel %vm377_vm8, %v386_v15, 0.0 }
  0x6d   : > { %v388_v17 = vrot.slane %v387_v16, 4 }
  0x6f   : > { %v389_v18 = vadd.f32 %v388_v17, %v387_v16 }
  0x71   : > { %v390_v19 = vrot.slane %v389_v18, 2 }
  0x73   : > { %v391_v20 = vadd.f32 %v390_v19, %v389_v18 }
  0x75   : > { %v392_v21 = vrot.slane %v391_v20, 1 }
  0x77   : > { %v393_v22 = vadd.f32 %v392_v21, %v391_v20 }
  0x79   : > { %394 = vst [vmem:[%s220_s3 + $0x1] sm:$0x1] %v393_v22 }
  0x7a PF: > { %s18_s14 = sadd.s32 1, %s721_s14   ;;  %s937_s9 = smov %s705_s10 }
  0x7b   : > { %p15_p0 = scmp.ge.s32.totalorder %s18_s14, 4   ;;  %s938_s10 = smov %s709_s11 }
  0x7c   : > { %s939_s11 = smov %s790_s21  ;;  %s940_s12 = smov %s717_s13 }
  0x7d   : > { %s941_s13 = smov %s943_s16  ;;  %17 = sbr.rel (!%p15_p0) target bundleno = 6 (0x6), region = 92 }
  0x82   :  { %423 = vsyncpa [#allocation6], 1 }
  0x83   :  { %425 = vsyncpa [#allocation6 + $0x1], 1 }
  0x84   :  { %426 = vsyncpa [#allocation8], 1 }
  0x85   :  { %428 = vsyncpa [#allocation8 + $0x1], 1 }

</bundles_post_ra>
